<compile_context>
chip_gen: v7x
topology: tpu7x:2x2x1
jax: 0.10.0
libtpu: 0.0.40
codegen_flags: <defaults>
</compile_context>

<pallas_src>
import functools

import jax
import jax.numpy as jnp
from jax.experimental import pallas as pl
from jax.experimental.pallas import tpu as pltpu


# --------------------------------- kernel ------------------------------------

def rt_gcn_kernel(x_ref, wcat_ref, b1_ref, wt_ref, bout_ref, o_ref):
    Bn, T, cin_v = x_ref.shape
    cout_v = o_ref.shape[2]
    Kt = wt_ref.shape[0] // cout_v
    pad = (Kt - 1) // 2

    x2d = x_ref[...].reshape(Bn * T, cin_v)            # bf16, lane-dense, M = Bn*T

    # ---- fused graph-conv (+BN1 scale) and residual 1x1 conv (+BNr scale) ------
    # one MXU matmul with a 2*cout_v-wide output; lane-split at cout_v (128-aligned)
    zz = jnp.dot(x2d, wcat_ref[...], preferred_element_type=jnp.float32)
    z = jnp.maximum(zz[:, :cout_v] + b1_ref[...], 0.0)  # ReLU(BN1(gcn)), f32
    res = zz[:, cout_v:]                                 # residual (bias folded into bout)

    # ---- temporal (Kt,1) conv: zero-padded bf16 slab built in registers --------
    z3 = z.reshape(Bn, T, cout_v).astype(x2d.dtype)      # single f32->bf16 cast
    if pad > 0:
        halo = jnp.zeros((Bn, pad, cout_v), x2d.dtype)
        z3 = jnp.concatenate([halo, z3, halo], axis=1)   # (Bn, T+2*pad, cout_v)
    # lane-concat the Kt shifted views -> one MXU matmul over Kt*cout_v contraction
    lhs = jnp.concatenate([z3[:, dt:dt + T, :] for dt in range(Kt)], axis=-1)
    lhs = lhs.reshape(Bn * T, Kt * cout_v)
    acc = jnp.dot(lhs, wt_ref[...], preferred_element_type=jnp.float32)

    # ---- merge, bias, LeakyReLU(0.2), bf16 lane-dense store ---------------------
    # TODO(synk): Dropout(p>0), temporal stride>1 and the identity-residual /
    # residual=False variants are not wired here (eval-mode conv-residual only).
    out = acc + res + bout_ref[...]
    out = jnp.maximum(out, 0.2 * out)
    o_ref[...] = out.reshape(Bn, T, cout_v).astype(o_ref.dtype)


# ------------------------------ host-side prep -------------------------------

def _full_spec(arr):
    nd = arr.ndim
    # TODO(synk): at large C_out*V these constant-index weights should be
    # single-buffered (pipeline_mode=pl.Buffered(1)) to save VMEM on v7x.
    return pl.BlockSpec(arr.shape, lambda n, _nd=nd: (0,) * _nd)


def _pack_operands(x, A, p):
    """Weight folding + channels-last lane-dense layout (runs in XLA, once per call).

    Folds conv biases through A / into BN shifts, BN scales into the matmul weights,
    fuses (wg, A, sum over K) into one graph-conv matrix, concatenates it with the
    residual 1x1 mixer into a single (C_in*V, 2*C_out*V) weight, and packs the
    kron-expanded temporal weights into one (Kt*C_out*V, C_out*V) matrix.
    Matmul operands are cast to bfloat16 (accumulation stays f32 in-kernel).
    """
    N, C_in, T, V = x.shape
    K, Cout, _ = p["w_gcn"].shape
    Kt = p["w_tcn"].shape[0]
    cin_v, cout_v = C_in * V, Cout * V
    f32, bf16 = jnp.float32, jnp.bfloat16

    bn1s, bn1b = p["bn1_scale"][:, 0], p["bn1_shift"][:, 0]
    bn2s, bn2b = p["bn2_scale"][:, 0], p["bn2_shift"][:, 0]
    bnrs, bnrb = p["bnr_scale"][:, 0], p["bnr_shift"][:, 0]
    eye_v = jnp.eye(V, dtype=f32)

    # fused graph-conv weight: Wm[(ci,v),(o,w)] = sum_k wg[k,o,ci] * A[k,v,w] * bn1s[o]
    wm = jnp.einsum('koc,kvw->cvow', p["w_gcn"], A).reshape(cin_v, cout_v)
    wm = wm * jnp.repeat(bn1s, V)[None, :]
    # 1x1-conv bias folded through A (constant over v) and through BN1
    gcn_bias = jnp.einsum('ko,kw->ow', p["b_gcn"][:, :, 0], jnp.sum(A, axis=1))  # (Cout, V)
    b1 = (gcn_bias * bn1s[:, None] + bn1b[:, None]).reshape(1, cout_v)

    # residual 1x1 conv (+ BN_r scale); its bias goes into the merged output bias
    wr = jnp.kron(p["w_res"].T, eye_v) * jnp.repeat(bnrs, V)[None, :]
    w_cat = jnp.concatenate([wm, wr], axis=1)                      # (cin_v, 2*cout_v)

    # temporal conv weights expanded to the (Cout*V) lane dim, BN2 scale folded in,
    # packed so a single matmul contracts over the Kt*cout_v lane-concatenated LHS
    wt = jnp.stack([jnp.kron(p["w_tcn"][dt].T, eye_v) for dt in range(Kt)])
    wt = wt * jnp.repeat(bn2s, V)[None, None, :]
    wt = wt.reshape(Kt * cout_v, cout_v)

    # merged output bias: (b_tcn through BN2) + (b_res through BN_r)
    b2 = jnp.repeat(p["b_tcn"][:, 0] * bn2s + bn2b, V)
    br = jnp.repeat(p["b_res"][:, 0] * bnrs + bnrb, V)
    bout = (b2 + br).reshape(1, cout_v)

    # channels-last lane-dense input slab: x_cl[n, t, ci*V + v] = x[n, ci, t, v]
    x_cl = jnp.transpose(x, (0, 2, 1, 3)).reshape(N, T, cin_v)

    return (x_cl.astype(bf16), w_cat.astype(bf16), b1.astype(f32),
            wt.astype(bf16), bout.astype(f32))


def _vmem_budget(block_n, T, cin_v, cout_v, Kt, pad_t, weights):
    bf, f32 = 2, 4
    io = 2 * block_n * T * (cin_v + cout_v) * bf                 # double-buffered in/out
    w = 2 * sum(int(a.size) * a.dtype.itemsize for a in weights)  # (default-buffered) weights
    live = block_n * T * (2 * cout_v * f32 + cout_v * f32 + Kt * cout_v * bf)
    live += block_n * (T + 2 * pad_t) * cout_v * bf               # padded z slab
    est = io + w + 2 * live
    # 32 MiB floor (v5e scoped default is only 16 MiB), 64 MiB cap (v7x physical VMEM)
    return int(min(max(est, 32 * 1024 * 1024), 64 * 1024 * 1024))


def rt_gcn_forward(x, A, params, block_n=None):
    N, C_in, T, V = x.shape
    _, Cout, _ = params["w_gcn"].shape
    Kt = params["w_tcn"].shape[0]
    pad_t = (Kt - 1) // 2
    cin_v, cout_v = C_in * V, Cout * V

    x_cl, w_cat, b1, wt, bout = _pack_operands(x, A, params)
    weights = (w_cat, b1, wt, bout)

    # Batch samples into the matmul M dimension: target Bn*T >= 256 rows (MXU height
    # on v6e/v7x; also >= 128 for v5e) while keeping >= 2 grid steps when possible.
    if block_n is None:
        block_n = max(1, min(N, pl.cdiv(256, T)))
    n_steps = pl.cdiv(N, block_n)
    n_pad = n_steps * block_n
    if n_pad != N:
        x_cl = jnp.pad(x_cl, ((0, n_pad - N), (0, 0), (0, 0)))

    grid_spec = pltpu.PrefetchScalarGridSpec(
        num_scalar_prefetch=0,
        grid=(n_steps,),                              # parallel -> both v7x TensorCores
        in_specs=[pl.BlockSpec((block_n, T, cin_v), lambda n: (n, 0, 0))]
                 + [_full_spec(w) for w in weights],
        out_specs=pl.BlockSpec((block_n, T, cout_v), lambda n: (n, 0, 0)),
    )

    out_cl = pl.pallas_call(
        rt_gcn_kernel,
        out_shape=jax.ShapeDtypeStruct((n_pad, T, cout_v), jnp.bfloat16),
        grid_spec=grid_spec,
        compiler_params=pltpu.CompilerParams(
            dimension_semantics=("parallel",),
            vmem_limit_bytes=_vmem_budget(block_n, T, cin_v, cout_v, Kt, pad_t, weights)),
    )(x_cl, *weights)

    # layout plumbing back to the PyTorch (N, C, T, V) convention
    out = out_cl[:N].reshape(N, T, Cout, V).transpose(0, 2, 1, 3)
    return out, A


# ---------------- parameter construction (deterministic, synthetic) -----------

def _fold_bn(gamma, beta, mean, var, eps=1e-5):
    scale = gamma / jnp.sqrt(var + eps)
    shift = beta - mean * scale
    return scale.reshape(-1, 1).astype(jnp.float32), shift.reshape(-1, 1).astype(jnp.float32)


def init_params(key, c_in, c_out, K, Kt):
    keys = jax.random.split(key, 12)

    def bn_params(k):
        k1, k2, k3, k4 = jax.random.split(k, 4)
        gamma = 1.0 + 0.1 * jax.random.normal(k1, (c_out,))
        beta = 0.1 * jax.random.normal(k2, (c_out,))
        mean = 0.1 * jax.random.normal(k3, (c_out,))
        var = 1.0 + 0.1 * jax.random.uniform(k4, (c_out,))
        return _fold_bn(gamma, beta, mean, var)

    bn1_scale, bn1_shift = bn_params(keys[2])
    bn2_scale, bn2_shift = bn_params(keys[5])
    bnr_scale, bnr_shift = bn_params(keys[8])
    return dict(
        w_gcn=0.2 * jax.random.normal(keys[0], (K, c_out, c_in), jnp.float32),
        b_gcn=0.1 * jax.random.normal(keys[1], (K, c_out, 1), jnp.float32),
        bn1_scale=bn1_scale, bn1_shift=bn1_shift,
        w_tcn=0.2 * jax.random.normal(keys[3], (Kt, c_out, c_out), jnp.float32),
        b_tcn=0.1 * jax.random.normal(keys[4], (c_out, 1), jnp.float32),
        bn2_scale=bn2_scale, bn2_shift=bn2_shift,
        w_res=0.2 * jax.random.normal(keys[6], (c_out, c_in), jnp.float32),
        b_res=0.1 * jax.random.normal(keys[7], (c_out, 1), jnp.float32),
        bnr_scale=bnr_scale, bnr_shift=bnr_shift,
    )


# ---------------- plain-JAX reference for correctness check -------------------

def rt_gcn_reference(x, A, p):
    hp = jax.lax.Precision.HIGHEST
    N, C_in, T, V = x.shape
    K, Cout, _ = p["w_gcn"].shape
    Kt = p["w_tcn"].shape[0]
    pad = (Kt - 1) // 2
    y = jnp.einsum('koc,nctv->nkotv', p["w_gcn"], x, precision=hp) + p["b_gcn"][None, :, :, :, None]
    z = jnp.einsum('nkctv,kvw->nctw', y, A, precision=hp)
    z = z * p["bn1_scale"][None, :, :, None] + p["bn1_shift"][None, :, :, None]
    z = jnp.maximum(z, 0.0)
    zp = jnp.pad(z, ((0, 0), (0, 0), (pad, pad), (0, 0)))
    out = jnp.zeros((N, Cout, T, V), jnp.float32)
    for dt in range(Kt):
        out = out + jnp.einsum('oc,nctv->notv', p["w_tcn"][dt], zp[:, :, dt:dt + T, :],
                               precision=hp)
    out = out + p["b_tcn"][None, :, :, None]
    out = out * p["bn2_scale"][None, :, :, None] + p["bn2_shift"][None, :, :, None]
    res = jnp.einsum('oc,nctv->notv', p["w_res"], x, precision=hp) + p["b_res"][None, :, :, None]
    res = res * p["bnr_scale"][None, :, :, None] + p["bnr_shift"][None, :, :, None]
    o = out + res
    return jnp.where(o > 0, o, 0.2 * o), A


if __name__ == "__main__":
    # Small shapes: V=16, Cout=8 -> Cout*V = 128 (lane-dense); block_n=4, T=16 ->
    # 64-row matmuls per step and a 2-step parallel grid.
    N, C_in, C_out, T, V = 8, 4, 8, 16, 16
    K, Kt = 2, 3                            # kernel_size = (3, 2): temporal=3, spatial=2

    key = jax.random.PRNGKey(0)
    kx, ka, kp = jax.random.split(key, 3)
    x = jax.random.normal(kx, (N, C_in, T, V), jnp.float32)
    A = jax.random.uniform(ka, (K, V, V), jnp.float32)
    A = A / jnp.sum(A, axis=-1, keepdims=True)      # row-normalized adjacency
    params = init_params(kp, C_in, C_out, K, Kt)

    fwd = jax.jit(functools.partial(rt_gcn_forward, block_n=4))
    out, A_out = fwd(x, A, params)
    out = jax.block_until_ready(out)

    ref, _ = rt_gcn_reference(x, A, params)
    assert out.shape == (N, C_out, T, V)
    # bf16 MXU operands + bf16 output (f32 accumulation) -> bf16-appropriate tolerance.
    out_f32 = out.astype(jnp.float32)
    assert bool(jnp.allclose(out_f32, ref, rtol=2e-2, atol=2e-2)), (
        f"mismatch vs reference, max abs err = {float(jnp.max(jnp.abs(out_f32 - ref)))}")
    print("KERNEL_OK")
</pallas_src>

<mosaic_0001>
module attributes {stable_mosaic.version = 11 : i64} {
  func.func @rt_gcn_kernel(%arg0: i32, %arg1: memref<4x16x64xbf16, #tpu.memory_space<vmem>>, %arg2: memref<64x256xbf16, #tpu.memory_space<vmem>>, %arg3: memref<1x128xf32, #tpu.memory_space<vmem>>, %arg4: memref<384x128xbf16, #tpu.memory_space<vmem>>, %arg5: memref<1x128xf32, #tpu.memory_space<vmem>>, %arg6: memref<4x16x128xbf16, #tpu.memory_space<vmem>>) attributes {dimension_semantics = [#tpu.dimension_semantics<parallel>], iteration_bounds = array<i64: 2>, scalar_prefetch = 0 : i64, scratch_operands = 0 : i64, tpu.core_type = #tpu.core_type<tc>, window_params = [{transform_indices = @transform_0, window_bounds = array<i64: 4, 16, 64>}, {pipeline_mode = #tpu.pipeline_mode<synchronous>, transform_indices = @transform_1, window_bounds = array<i64: 64, 256>}, {pipeline_mode = #tpu.pipeline_mode<synchronous>, transform_indices = @transform_2, window_bounds = array<i64: 1, 128>}, {pipeline_mode = #tpu.pipeline_mode<synchronous>, transform_indices = @transform_3, window_bounds = array<i64: 384, 128>}, {pipeline_mode = #tpu.pipeline_mode<synchronous>, transform_indices = @transform_4, window_bounds = array<i64: 1, 128>}, {transform_indices = @transform_5, window_bounds = array<i64: 4, 16, 128>}]} {
    %c0 = arith.constant 0 : index
    %c0_0 = arith.constant 0 : index
    %c0_1 = arith.constant 0 : index
    %0 = vector.load %arg1[%c0, %c0_0, %c0_1] : memref<4x16x64xbf16, #tpu.memory_space<vmem>>, vector<4x16x64xbf16>
    %1 = vector.shape_cast %0 : vector<4x16x64xbf16> to vector<64x64xbf16>
    %c0_2 = arith.constant 0 : index
    %c0_3 = arith.constant 0 : index
    %2 = vector.load %arg2[%c0_2, %c0_3] : memref<64x256xbf16, #tpu.memory_space<vmem>>, vector<64x256xbf16>
    %cst = arith.constant dense<0.000000e+00> : vector<64x256xf32>
    %3 = tpu.matmul %1, %2, %cst {dimension_numbers = #tpu.dot_dimension_numbers<[1], [0], [0], [1], [0, 0, 1, 1], [], []>} : vector<64x64xbf16>, vector<64x256xbf16>, vector<64x256xf32> -> vector<64x256xf32>
    %4 = vector.extract_strided_slice %3 {offsets = [0, 0], sizes = [64, 128], strides = [1, 1]} : vector<64x256xf32> to vector<64x128xf32>
    %c0_4 = arith.constant 0 : index
    %c0_5 = arith.constant 0 : index
    %5 = vector.load %arg3[%c0_4, %c0_5] : memref<1x128xf32, #tpu.memory_space<vmem>>, vector<1x128xf32>
    %6 = vector.broadcast %5 : vector<1x128xf32> to vector<64x128xf32>
    %7 = arith.addf %4, %6 : vector<64x128xf32>
    %cst_6 = arith.constant 0.000000e+00 : f32
    %8 = vector.broadcast %cst_6 : f32 to vector<64x128xf32>
    %9 = arith.maximumf %7, %8 : vector<64x128xf32>
    %10 = vector.extract_strided_slice %3 {offsets = [0, 128], sizes = [64, 128], strides = [1, 1]} : vector<64x256xf32> to vector<64x128xf32>
    %11 = vector.shape_cast %9 : vector<64x128xf32> to vector<4x16x128xf32>
    %12 = arith.truncf %11 : vector<4x16x128xf32> to vector<4x16x128xbf16>
    %cst_7 = arith.constant 0.000000e+00 : bf16
    %13 = vector.broadcast %cst_7 : bf16 to vector<4x1x128xbf16>
    %14 = tpu.concatenate %13, %12, %13 in 1 : vector<4x1x128xbf16>, vector<4x16x128xbf16>, vector<4x1x128xbf16> -> vector<4x18x128xbf16>
    %15 = vector.extract_strided_slice %14 {offsets = [0, 0, 0], sizes = [4, 16, 128], strides = [1, 1, 1]} : vector<4x18x128xbf16> to vector<4x16x128xbf16>
    %16 = vector.extract_strided_slice %14 {offsets = [0, 1, 0], sizes = [4, 16, 128], strides = [1, 1, 1]} : vector<4x18x128xbf16> to vector<4x16x128xbf16>
    %17 = vector.extract_strided_slice %14 {offsets = [0, 2, 0], sizes = [4, 16, 128], strides = [1, 1, 1]} : vector<4x18x128xbf16> to vector<4x16x128xbf16>
    %18 = tpu.concatenate %15, %16, %17 in 2 : vector<4x16x128xbf16>, vector<4x16x128xbf16>, vector<4x16x128xbf16> -> vector<4x16x384xbf16>
    %19 = vector.shape_cast %18 : vector<4x16x384xbf16> to vector<64x384xbf16>
    %c0_8 = arith.constant 0 : index
    %c0_9 = arith.constant 0 : index
    %20 = vector.load %arg4[%c0_8, %c0_9] : memref<384x128xbf16, #tpu.memory_space<vmem>>, vector<384x128xbf16>
    %cst_10 = arith.constant dense<0.000000e+00> : vector<64x128xf32>
    %21 = tpu.matmul %19, %20, %cst_10 {dimension_numbers = #tpu.dot_dimension_numbers<[1], [0], [0], [1], [0, 0, 1, 1], [], []>} : vector<64x384xbf16>, vector<384x128xbf16>, vector<64x128xf32> -> vector<64x128xf32>
    %22 = arith.addf %21, %10 : vector<64x128xf32>
    %c0_11 = arith.constant 0 : index
    %c0_12 = arith.constant 0 : index
    %23 = vector.load %arg5[%c0_11, %c0_12] : memref<1x128xf32, #tpu.memory_space<vmem>>, vector<1x128xf32>
    %24 = vector.broadcast %23 : vector<1x128xf32> to vector<64x128xf32>
    %25 = arith.addf %22, %24 : vector<64x128xf32>
    %cst_13 = arith.constant 2.000000e-01 : f32
    %26 = vector.broadcast %cst_13 : f32 to vector<64x128xf32>
    %27 = arith.mulf %26, %25 : vector<64x128xf32>
    %28 = arith.maximumf %25, %27 : vector<64x128xf32>
    %29 = vector.shape_cast %28 : vector<64x128xf32> to vector<4x16x128xf32>
    %30 = arith.truncf %29 : vector<4x16x128xf32> to vector<4x16x128xbf16>
    %c0_14 = arith.constant 0 : index
    %c0_15 = arith.constant 0 : index
    %c0_16 = arith.constant 0 : index
    %31 = vector.load %arg6[%c0_14, %c0_15, %c0_16] : memref<4x16x128xbf16, #tpu.memory_space<vmem>>, vector<4x16x128xbf16>
    tpu.vector_store %arg6[%c0_14, %c0_15, %c0_16], %30 {strides = array<i32>} : memref<4x16x128xbf16, #tpu.memory_space<vmem>>, vector<4x16x128xbf16>,
    return
  }
  func.func @transform_0(%arg0: i32) -> (i32, i32, i32) {
    %c0_i32 = arith.constant 0 : i32
    %c0_i32_0 = arith.constant 0 : i32
    %c0_i32_1 = arith.constant 0 : i32
    return %arg0, %c0_i32, %c0_i32_0 : i32, i32, i32
  }
  func.func @transform_1(%arg0: i32) -> (i32, i32) {
    %c0_i32 = arith.constant 0 : i32
    %c0_i32_0 = arith.constant 0 : i32
    %c0_i32_1 = arith.constant 0 : i32
    return %c0_i32, %c0_i32_0 : i32, i32
  }
  func.func @transform_2(%arg0: i32) -> (i32, i32) {
    %c0_i32 = arith.constant 0 : i32
    %c0_i32_0 = arith.constant 0 : i32
    %c0_i32_1 = arith.constant 0 : i32
    return %c0_i32, %c0_i32_0 : i32, i32
  }
  func.func @transform_3(%arg0: i32) -> (i32, i32) {
    %c0_i32 = arith.constant 0 : i32
    %c0_i32_0 = arith.constant 0 : i32
    %c0_i32_1 = arith.constant 0 : i32
    return %c0_i32, %c0_i32_0 : i32, i32
  }
  func.func @transform_4(%arg0: i32) -> (i32, i32) {
    %c0_i32 = arith.constant 0 : i32
    %c0_i32_0 = arith.constant 0 : i32
    %c0_i32_1 = arith.constant 0 : i32
    return %c0_i32, %c0_i32_0 : i32, i32
  }
  func.func @transform_5(%arg0: i32) -> (i32, i32, i32) {
    %c0_i32 = arith.constant 0 : i32
    %c0_i32_0 = arith.constant 0 : i32
    %c0_i32_1 = arith.constant 0 : i32
    return %arg0, %c0_i32, %c0_i32_0 : i32, i32, i32
  }
}

</mosaic_0001>

<bundles_post_ra>
// kernel: mul.59
= control target key start
LH: loop header
LB: loop body
LE: loop exit
PB: predicated region body
PF: predicated region fallthrough
CT: control target
= control target key end

     0   :  { %s67_s10 = smov 112   ;;  %s68_s11 = smov 80   ;;  %vm3_vm0 = vcmask 130048   ;;  %vm9_vm1 = vcmask 1048448   ;;  %vm15_vm2 = vcmask 917248   ;;  %vm21_vm3 = vcmask 786048   ;;  %s111_s0 = inlined_call_operand.vmem [shape: f32[8,16], index: 0, kind: input, shape index: {}]   ;;  %s112_s1 = inlined_call_operand.vmem [shape: f32[128], index: 1, kind: output, shape index: {}]  }
   0x1   :  { %v53_v0 = vld [vmem:[%s111_s0 + $0x7] sm:$0x1]   ;;  %v55_v1 = vld [vmem:[%s111_s0 + $0x5] sm:$0x1]   ;;  %v54_v2 = vld [vmem:[%s111_s0 + $0x6] sm:$0x1]  }
   0x2   :  { %7 = vrot.lane.b32.xlu0 %v53_v0, %s67_s10  ;;  %19 = vrot.lane.b32.xlu1 %v55_v1, %s68_s11  ;;  %v56_v3 = vld [vmem:[%s111_s0 + $0x4] sm:$0x1]   ;;  %v2_v4 = vld [vmem:[%s111_s0] sm:$0x1]   ;;  %s69_s18 = smov 96   ;;  %s70_s19 = smov 64  }
   0x3   :  { %4 = vst.msk [vmem:[#allocation0] sm:$0x1] %vm3_vm0, %v2_v4   ;;  %v57_v5 = vld [vmem:[%s111_s0 + $0x3] sm:$0x1]   ;;  %v58_v6 = vld [vmem:[%s111_s0 + $0x2] sm:$0x1]  }
   0x4   :  { %s71_s24 = smov 48   ;;  %s72_s25 = smov 32   ;;  %v59_v7 = vld [vmem:[%s111_s0 + $0x1] sm:$0x1]   ;;  %vm27_vm4 = vcmask 654848   ;;  %vm33_vm5 = vcmask 523648  }
   0x5   :  { %s73_s0 = smov 16   ;;  %vm39_vm6 = vcmask 392448   ;;  %vm45_vm7 = vcmask 261248  }
   0x6   :  { %13 = vrot.lane.b32.xlu0 %v54_v2, %s69_s18  ;;  %25 = vrot.lane.b32.xlu1 %v56_v3, %s70_s19 }
   0xa   :  { %31 = vrot.lane.b32.xlu0 %v57_v5, %s71_s24  ;;  %37 = vrot.lane.b32.xlu1 %v58_v6, %s72_s25 }
   0xe   :  { %43 = vrot.lane.b32.xlu0 %v59_v7, %s73_s0 }
  0x74   :  { %v8_v8 = vpop.permute.xlu0 %7   ;;  %v20_v9 = vpop.permute.xlu1 %19  }
  0x75   :  { %10 = vst.msk [vmem:[#allocation0] sm:$0x1] %vm9_vm1, %v8_v8  }
  0x78   :  { %v14_v10 = vpop.permute.xlu0 %13   ;;  %v26_v11 = vpop.permute.xlu1 %25  }
  0x79   :  { %16 = vst.msk [vmem:[#allocation0] sm:$0x1] %vm15_vm2, %v14_v10  }
  0x7a   :  { %22 = vst.msk [vmem:[#allocation0] sm:$0x1] %vm21_vm3, %v20_v9  }
  0x7b   :  { %28 = vst.msk [vmem:[#allocation0] sm:$0x1] %vm27_vm4, %v26_v11  }
  0x7c   :  { %v32_v12 = vpop.permute.xlu0 %31   ;;  %v38_v13 = vpop.permute.xlu1 %37  }
  0x7d   :  { %34 = vst.msk [vmem:[#allocation0] sm:$0x1] %vm33_vm5, %v32_v12  }
  0x7e   :  { %40 = vst.msk [vmem:[#allocation0] sm:$0x1] %vm39_vm6, %v38_v13  }
  0x80   :  { %v44_v14 = vpop.permute.xlu0 %43  }
  0x81   :  { %46 = vst.msk [vmem:[#allocation0] sm:$0x1] %vm45_vm7, %v44_v14  }
  0x88   :  { %v50_v15 = vld [vmem:[#allocation0] sm:$0x1] }
  0x89   :  { %52 = vst [vmem:[%s112_s1] sm:$0x1] %v50_v15 }

// kernel: rt_gcn_forward.1
= control target key start
LH: loop header
LB: loop body
LE: loop exit
PB: predicated region body
PF: predicated region fallthrough
CT: control target
= control target key end

     0   :  { %s1259_s18 = smov 0   ;;  %s1473_s0 = inlined_call_operand.vmem [shape: bf16[8,16,64], index: 0, kind: input, shape index: {}]   ;;  %s1474_s1 = inlined_call_operand.vmem [shape: bf16[64,256], index: 1, kind: input, shape index: {}]   ;;  %s1475_s2 = inlined_call_operand.vmem [shape: f32[1,128], index: 2, kind: input, shape index: {}]   ;;  %s1476_s3 = inlined_call_operand.vmem [shape: bf16[384,128], index: 3, kind: input, shape index: {}]   ;;  %s1477_s4 = inlined_call_operand.vmem [shape: f32[1,128], index: 4, kind: input, shape index: {}]   ;;  %s1478_s5 = inlined_call_operand.vmem [shape: bf16[8,16,128], index: 5, kind: output, shape index: {}]  }
   0x1 LB: > { %s999_s19 = sadd.s32 4294967295, %s1226_s18   ;;  %p1003_p0 = scmp.ge.s32.totalorder %s1226_s18, 1  ;;  %s1226_s18 = sphi %s1259_s18, %s15_s18  }
   0x2   : > { %p189_p1 = scmp.lt.s32.totalorder %s1226_s18, 3 }
   0x4   : > { %p190_p2 = pnand %p1003_p0, %p189_p1 }
   0x5   : > { %v1180_v0 = vld [vmem:[%s1474_s1 + $0x4] ss:$8 sps:$4 sm:$0xff] (!%p190_p2)   ;;  %s1004_s22 = sshll.u32 (!%p190_p2), %s999_s19, 2  ;;  %v1182_v1 = vld [vmem:[%s1474_s1] ss:$8 sps:$4 sm:$0xff] (!%p190_p2)   ;;  %v1228_v2 = vmov (!%p190_p2), 0  }
   0x6   : > { %193 = sbr.rel (%p190_p2) target bundleno = 511 (0x1ff), region = 40  ;;  %355 = vmatprep.mubr.bf16.mxu0 (!%p190_p2), %v1228_v2  ;;  %p220_p3 = scmp.lt.s32.totalorder (!%p190_p2), %s1004_s22, 7  ;;  %323 = vmatprep.subr.bf16.mxu0 (!%p190_p2), %v1180_v0  ;;  %v1183_v3 = vld [vmem:[%s1474_s1 + $0x14] ss:$8 sps:$4 sm:$0xff] (!%p190_p2)   ;;  %v1185_v4 = vld [vmem:[%s1474_s1 + $0x10] ss:$8 sps:$4 sm:$0xff] (!%p190_p2)  }
   0x7   : > { %324 = vmatpush1.bf16.msra.mxu0 (!%p190_p2), %v1182_v1  ;;  %v1186_v5 = vld [vmem:[%s1474_s1 + $0x24] ss:$8 sps:$4 sm:$0xff] (!%p190_p2)   ;;  %v1188_v7 = vld [vmem:[%s1474_s1 + $0x20] ss:$8 sps:$4 sm:$0xff] (!%p190_p2)   ;;  %v1189_v8 = vld [vmem:[%s1474_s1 + $0x34] ss:$8 sps:$4 sm:$0xff] (!%p190_p2)  }
   0x8   : > { %325 = vmatprep.subr.bf16.mxu0 (!%p190_p2), %v1183_v3  ;;  %v1196_v6 = vld [vmem:[%s1476_s3 + $0x40] sm:$0xff] (!%p190_p2)   ;;  %v1191_v9 = vld [vmem:[%s1474_s1 + $0x30] ss:$8 sps:$4 sm:$0xff] (!%p190_p2)   ;;  %v1199_v13 = vld [vmem:[%s1476_s3 + $0x48] sm:$0xff] (!%p190_p2)   ;;  %vm310_vm0 = vcmask (!%p190_p2), 523264   ;;  %vm459_vm1 = vcmask (!%p190_p2), 1040384  }
   0x9   : > { %1095 = vmatprep.subr.bf16.mxu1 (!%p190_p2), %v1196_v6  ;;  %v1197_v10 = vld [vmem:[%s1476_s3] sm:$0xff] (!%p190_p2)   ;;  %v1200_v14 = vld [vmem:[%s1476_s3 + $0x8] sm:$0xff] (!%p190_p2)   ;;  %v1202_v19 = vld [vmem:[%s1476_s3 + $0x50] sm:$0xff] (!%p190_p2)   ;;  %vm460_vm2 = vsmask.f32 (!%p190_p2), 256  ;;  %vm531_vm4 = vcmask (!%p190_p2), 1046528  }
   0xa   : > { %v1198_v12 = vld [vmem:[%s1476_s3 + $0x80] sm:$0xff] (!%p190_p2)   ;;  %1096 = vmatpush3.bf16.msra.mxu1 (!%p190_p2), %v1197_v10  ;;  %v1201_v15 = vld [vmem:[%s1476_s3 + $0x88] sm:$0xff] (!%p190_p2)   ;;  %v1203_v20 = vld [vmem:[%s1476_s3 + $0x10] sm:$0xff] (!%p190_p2)   ;;  %vm470_vm5 = vsmask.f32 (!%p190_p2), 7424 }
   0xb   : > { %326 = vmatpush1.bf16.msra.mxu0 (!%p190_p2), %v1185_v4  ;;  %1097 = vmatprep.subr.bf16.mxu1 (!%p190_p2), %v1199_v13  ;;  %v1204_v21 = vld [vmem:[%s1476_s3 + $0x90] sm:$0xff] (!%p190_p2)   ;;  %v1205_v22 = vld [vmem:[%s1476_s3 + $0x58] sm:$0xff] (!%p190_p2)   ;;  %v1208_v25 = vld [vmem:[%s1476_s3 + $0x60] sm:$0xff] (!%p190_p2)  }
   0xc   : > { %327 = vmatprep.subr.bf16.mxu0 (!%p190_p2), %v1186_v5  ;;  %v1206_v23 = vld [vmem:[%s1476_s3 + $0x18] sm:$0xff] (!%p190_p2)   ;;  %v1209_v26 = vld [vmem:[%s1476_s3 + $0x20] sm:$0xff] (!%p190_p2)   ;;  %v1211_v28 = vld [vmem:[%s1476_s3 + $0x68] sm:$0xff] (!%p190_p2)  }
   0xd   : > { %s1482_s22 = smov (!%p220_p3, %s1004_s22), 7  ;;  %v1207_v24 = vld [vmem:[%s1476_s3 + $0x98] sm:$0xff]   ;;  %v1210_v27 = vld [vmem:[%s1476_s3 + $0xa0] sm:$0xff]   ;;  %v1212_v29 = vld [vmem:[%s1476_s3 + $0x28] sm:$0xff]  }
   0xe   : > { %s1062_s6 = sshll.u32 %s1482_s22, 3  ;;  %1098 = vmatpush3.bf16.msra.mxu1 %v1200_v14  ;;  %v1213_v30 = vld [vmem:[%s1476_s3 + $0xa8] sm:$0xff]   ;;  %v1214_v31 = vld [vmem:[%s1476_s3 + $0x70] sm:$0xff]   ;;  %v1217_v34 = vld [vmem:[%s1476_s3 + $0x78] sm:$0xff]  }
   0xf   : > { %s1293_s11 = scalar_lea.vmem %s1473_s0, %s1062_s6  ;;  %328 = vmatpush1.bf16.msra.mxu0 %v1188_v7  ;;  %1099 = vmatprep.subr.bf16.mxu1 %v1202_v19  ;;  %v1215_v32 = vld [vmem:[%s1476_s3 + $0x30] sm:$0xff]   ;;  %v1218_v35 = vld [vmem:[%s1476_s3 + $0x38] sm:$0xff]   ;;  %v1384_v37 = vld [vmem:[%s1475_s2] ss:$0 sm:$0xff]  ;;  %s1454_s28 = scalar_lea.vmem %s1478_s5, %s1062_s6 }
  0x10   : > { %329 = vmatprep.subr.bf16.mxu0 %v1189_v8  ;;  %v1192_v11 = vld [vmem:[%s1293_s11] sm:$0xff]   ;;  %v1193_v16 = vld [vmem:[%s1293_s11 + $0x8] sm:$0xff]   ;;  %v1194_v17 = vld [vmem:[%s1293_s11 + $0x10] sm:$0xff]  }
  0x11   : > { %v1195_v18 = vld [vmem:[%s1293_s11 + $0x18] sm:$0xff]   ;;  %v1216_v33 = vld [vmem:[%s1476_s3 + $0xb0] sm:$0xff]   ;;  %vm1395_vm3 = vmand %vm459_vm1, %vm460_vm2 }
  0x12   : > { %1100 = vmatpush3.bf16.msra.mxu1 %v1203_v20  ;;  %v1219_v36 = vld [vmem:[%s1476_s3 + $0xb8] sm:$0xff]  }
  0x13   : > { %330 = vmatpush1.bf16.msra.mxu0 %v1191_v9  ;;  %1101 = vmatprep.subr.bf16.mxu1 %v1205_v22 }
  0x14   : > { %1147 = vmatprep.subr.bf16.mxu0 %v1198_v12 }
  0x16   : > { %1022 = vmatmul.mubr.msk.bf16.vlgmr.msra.gmra.mrb[0].mxu0 %vm310_vm0, %v1192_v11  ;;  %1102 = vmatpush3.bf16.msra.mxu1 %v1206_v23 }
  0x17   : > { %365 = vmatprep.mubr.bf16.mxu0 %v1228_v2  ;;  %1148 = vmatpush3.bf16.msra.mxu0 %v1198_v12 }
  0x18   : > { %1149 = vmatprep.subr.bf16.mxu0 %v1201_v15  ;;  %1103 = vmatprep.subr.bf16.mxu1 %v1208_v25 }
  0x1a   : > { %1104 = vmatpush3.bf16.msra.mxu1 %v1209_v26 }
  0x1b   : > { %1150 = vmatpush3.bf16.msra.mxu0 %v1201_v15  ;;  %1105 = vmatprep.subr.bf16.mxu1 %v1211_v28 }
  0x1c   : > { %1151 = vmatprep.subr.bf16.mxu0 %v1204_v21 }
  0x1e   : > { %1023 = vmatmul.mubr.msk.bf16.gmra.mrb[4].mxu0 %vm310_vm0, %v1193_v16  ;;  %1106 = vmatpush3.bf16.msra.mxu1 %v1212_v29 }
  0x1f   : > { %375 = vmatprep.mubr.bf16.mxu0 %v1228_v2  ;;  %1152 = vmatpush3.bf16.msra.mxu0 %v1204_v21 }
  0x20   : > { %1153 = vmatprep.subr.bf16.mxu0 %v1207_v24  ;;  %1107 = vmatprep.subr.bf16.mxu1 %v1214_v31 }
  0x22   : > { %1108 = vmatpush3.bf16.msra.mxu1 %v1215_v32 }
  0x23   : > { %1154 = vmatpush3.bf16.msra.mxu0 %v1207_v24  ;;  %1109 = vmatprep.subr.bf16.mxu1 %v1217_v34 }
  0x24   : > { %1155 = vmatprep.subr.bf16.mxu0 %v1210_v27 }
  0x26   : > { %1024 = vmatmul.mubr.msk.bf16.gmra.mrb[8].mxu0 %vm310_vm0, %v1194_v17  ;;  %1110 = vmatpush3.bf16.msra.mxu1 %v1218_v35 }
  0x27   : > { %385 = vmatprep.mubr.bf16.mxu0 %v1228_v2  ;;  %1156 = vmatpush3.bf16.msra.mxu0 %v1210_v27 }
  0x28   : > { %1157 = vmatprep.subr.bf16.mxu0 %v1213_v30 }
  0x2b   : > { %1158 = vmatpush3.bf16.msra.mxu0 %v1213_v30 }
  0x2c   : > { %1159 = vmatprep.subr.bf16.mxu0 %v1216_v33 }
  0x2e   : > { %1025 = vmatmul.mubr.msk.bf16.gmra.mrb[12].mxu0 %vm310_vm0, %v1195_v18 }
  0x2f   : > { %1160 = vmatpush3.bf16.msra.mxu0 %v1216_v33 }
  0x30   : > { %1161 = vmatprep.subr.bf16.mxu0 %v1219_v36 }
  0x33   : > { %1162 = vmatpush3.bf16.msra.mxu0 %v1219_v36 }
  0xe9   : > { %v357_v38 = vpop.f32.mrb[0].mxu0 }
  0xea   : > { %v403_v39 = vadd.f32 %v1384_v37, %v357_v38  ;;  %v1387_v40 = vpop.f32.mrb[1].mxu0 }
  0xeb   : > { %v361_v41 = vpop.f32.mrb[2].mxu0 }
  0xec   : > { %v404_v42 = vadd.f32 %v1384_v37, %v361_v41  ;;  %v1390_v43 = vpop.f32.mrb[3].mxu0  ;;  %v411_v44 = vmax.f32 %v403_v39, 0.0 }
  0xee   : > { %v412_v45 = vmax.f32 %v404_v42, 0.0 }
  0xf0   : > { %v419_v46 = vpack.c.bf16 %v412_v45, %v411_v44 }
  0xf1   : > { %v367_v47 = vpop.f32.mrb[4].mxu0 }
  0xf2   : > { %v424_v48 = vshrl.u32 %v419_v46, 16  ;;  %v405_v49 = vadd.f32 %v1384_v37, %v367_v47  ;;  %v1393_v50 = vpop.f32.mrb[5].mxu0  ;;  %v427_v54 = vshll.u32 %v419_v46, 16 }
  0xf3   : > { %v371_v52 = vpop.f32.mrb[6].mxu0 }
  0xf4   : > { %v426_v53 = vrot.slane %v424_v48, 7  ;;  %v406_v55 = vadd.f32 %v1384_v37, %v371_v52  ;;  %v1400_v56 = vpop.f32.mrb[7].mxu0  ;;  %v413_v58 = vmax.f32 %v405_v49, 0.0 }
  0xf6   : > { %v429_v57 = vor.u32 %v427_v54, %v426_v53  ;;  %v414_v59 = vmax.f32 %v406_v55, 0.0  ;;  %v466_v60 = vsel %vm1395_vm3, %v426_v53, 0 }
  0xf7   : > { %v533_v1 = vrot.slane %v466_v60, 1  ;;  %v479_v3 = vshll.u32 %v466_v60, 16 }
  0xf8   : > { %v462_v61 = vsel %vm1395_vm3, 0, %v429_v57  ;;  %v420_v62 = vpack.c.bf16 %v414_v59, %v413_v58 }
  0xf9   : > { %v377_v63 = vpop.f32.mrb[8].mxu0  ;;  %v532_v0 = vrot.slane %v462_v61, 1  ;;  %v474_v2 = vshll.u32 %v462_v61, 16  ;;  %v472_v9 = vshrl.u32 %v462_v61, 16  ;;  %v481_v16 = vrot.slane %v479_v3, 1 }
  0xfa   : > { %v431_v4 = vshrl.u32 %v420_v62, 16  ;;  %v407_v5 = vadd.f32 %v1384_v37, %v377_v63  ;;  %v1407_v6 = vpop.f32.mrb[9].mxu0  ;;  %v434_v12 = vshll.u32 %v420_v62, 16 }
  0xfb   : > { %v381_v7 = vpop.f32.mrb[10].mxu0  ;;  %v534_v8 = vsel %vm531_vm4, %v532_v0, %v533_v1  ;;  %v476_v10 = vrot.slane %v474_v2, 1 }
  0xfc   : > { %v433_v11 = vrot.slane %v431_v4, 7  ;;  %v408_v13 = vadd.f32 %v1384_v37, %v381_v7  ;;  %v1411_v14 = vpop.f32.mrb[11].mxu0  ;;  %1163 = vmatprep.mubr.bf16.mxu0 %v534_v8  ;;  %v415_v19 = vmax.f32 %v407_v5, 0.0 }
  0xfd   : > { %v477_v15 = vor.u32 %v476_v10, %v472_v9 }
  0xfe   : > { %v436_v17 = vor.u32 %v434_v12, %v433_v11  ;;  %v467_v18 = vsel %vm1395_vm3, %v433_v11, 0  ;;  %v416_v20 = vmax.f32 %v408_v13, 0.0 }
  0xff   : > { %v482_v21 = vsel %vm470_vm5, %v477_v15, %v481_v16  ;;  %v536_v24 = vrot.slane %v467_v18, 1  ;;  %v491_v28 = vshll.u32 %v467_v18, 16 }
 0x100   : > { %v463_v22 = vsel %vm1395_vm3, 0, %v436_v17  ;;  %v421_v23 = vpack.c.bf16 %v416_v20, %v415_v19  ;;  %772 = vmatprep.mubr.bf16.mxu1 %v482_v21 }
 0x101   : > { %v387_v25 = vpop.f32.mrb[12].mxu0  ;;  %773 = vmatmul.mubr.bf16.vlgmr.msra.gmra.mrb[0].mxu1 %v462_v61  ;;  %v535_v26 = vrot.slane %v463_v22, 1  ;;  %v486_v27 = vshll.u32 %v463_v22, 16  ;;  %v484_v34 = vshrl.u32 %v463_v22, 16  ;;  %v493_v44 = vrot.slane %v491_v28, 1 }
 0x102   : > { %v438_v29 = vshrl.u32 %v421_v23, 16  ;;  %v409_v30 = vadd.f32 %v1384_v37, %v387_v25  ;;  %v1419_v31 = vpop.f32.mrb[13].mxu0  ;;  %v441_v38 = vshll.u32 %v421_v23, 16 }
 0x103   : > { %v391_v32 = vpop.f32.mrb[14].mxu0  ;;  %v537_v33 = vsel %vm531_vm4, %v535_v26, %v536_v24  ;;  %v488_v35 = vrot.slane %v486_v27, 1  ;;  %v1442_v26 = vld [vmem:[%s1477_s4] ss:$0 sm:$0xff] }
 0x104   : > { %v440_v36 = vrot.slane %v438_v29, 7  ;;  %v410_v39 = vadd.f32 %v1384_v37, %v391_v32  ;;  %v1423_v41 = vpop.f32.mrb[15].mxu0  ;;  %1164 = vmatmul.mubr.bf16.vlgmr.msra.gmra.mrb[16].mxu0 %v537_v33  ;;  %v417_v46 = vmax.f32 %v409_v30, 0.0 }
 0x105   : > { %v489_v42 = vor.u32 %v488_v35, %v484_v34 }
 0x106   : > { %v443_v45 = vor.u32 %v441_v38, %v440_v36  ;;  %v418_v47 = vmax.f32 %v410_v39, 0.0  ;;  %v468_v48 = vsel %vm1395_vm3, %v440_v36, 0 }
 0x107   : > { %v494_v49 = vsel %vm470_vm5, %v489_v42, %v493_v44  ;;  %v539_v54 = vrot.slane %v468_v48, 1  ;;  %v503_v57 = vshll.u32 %v468_v48, 16 }
 0x108   : > { %v464_v52 = vsel %vm1395_vm3, 0, %v443_v45  ;;  %v422_v53 = vpack.c.bf16 %v418_v47, %v417_v46  ;;  %780 = vmatprep.mubr.bf16.mxu1 %v494_v49 }
 0x109   : > { %781 = vmatmul.mubr.bf16.gmra.mrb[4].mxu1 %v463_v22  ;;  %v538_v37 = vrot.slane %v464_v52, 1  ;;  %v498_v55 = vshll.u32 %v464_v52, 16  ;;  %v496_v60 = vshrl.u32 %v464_v52, 16  ;;  %v505_v1 = vrot.slane %v503_v57, 1 }
 0x10a   : > { %v445_v58 = vshrl.u32 %v422_v53, 16  ;;  %v448_v63 = vshll.u32 %v422_v53, 16 }
 0x10b   : > { %v540_v59 = vsel %vm531_vm4, %v538_v37, %v539_v54  ;;  %v500_v61 = vrot.slane %v498_v55, 1 }
 0x10c   : > { %v447_v62 = vrot.slane %v445_v58, 7  ;;  %1167 = vmatprep.mubr.bf16.mxu0 %v540_v59 }
 0x10d   : > { %v501_v0 = vor.u32 %v500_v61, %v496_v60 }
 0x10e   : > { %v450_v2 = vor.u32 %v448_v63, %v447_v62  ;;  %v469_v3 = vsel %vm1395_vm3, %v447_v62, 0 }
 0x10f   : > { %v506_v4 = vsel %vm470_vm5, %v501_v0, %v505_v1  ;;  %v542_v8 = vrot.slane %v469_v3, 1  ;;  %v515_v10 = vshll.u32 %v469_v3, 16 }
 0x110   : > { %v465_v5 = vsel %vm1395_vm3, 0, %v450_v2  ;;  %788 = vmatprep.mubr.bf16.mxu1 %v506_v4 }
 0x111   : > { %789 = vmatmul.mubr.bf16.gmra.mrb[8].mxu1 %v464_v52  ;;  %v541_v7 = vrot.slane %v465_v5, 1  ;;  %v510_v9 = vshll.u32 %v465_v5, 16  ;;  %v508_v12 = vshrl.u32 %v465_v5, 16  ;;  %v517_v16 = vrot.slane %v515_v10, 1 }
 0x113   : > { %v543_v11 = vsel %vm531_vm4, %v541_v7, %v542_v8  ;;  %v512_v13 = vrot.slane %v510_v9, 1 }
 0x114   : > { %1168 = vmatmul.mubr.bf16.gmra.mrb[20].mxu0 %v543_v11 }
 0x115   : > { %v513_v15 = vor.u32 %v512_v13, %v508_v12 }
 0x117   : > { %v518_v17 = vsel %vm470_vm5, %v513_v15, %v517_v16 }
 0x118   : > { %796 = vmatprep.mubr.bf16.mxu1 %v518_v17 }
 0x119   : > { %797 = vmatmul.mubr.bf16.gmra.mrb[12].mxu1 %v465_v5 }
 0x1d4   : > { %v1111_v18 = vpop.f32.mrb[0].mxu1 }
 0x1d5   : > { %v1112_v51 = vpop.f32.mrb[1].mxu1 }
 0x1d6   : > { %v1113_v19 = vadd.f32 %v1112_v51, %v1111_v18  ;;  %v1114_v20 = vpop.f32.mrb[2].mxu1 }
 0x1d7   : > { %v1115_v21 = vpop.f32.mrb[3].mxu1  ;;  %v1165_v22 = vpop.f32.mrb[16].mxu0 }
 0x1d8   : > { %v1116_v23 = vadd.f32 %v1115_v21, %v1114_v20  ;;  %v775_v24 = vadd.f32 %v1113_v19, %v1387_v40  ;;  %v839_v25 = vpop.f32.mrb[17].mxu0 }
 0x1d9   : > { %v1166_v27 = vpop.f32.mrb[18].mxu0 }
 0x1da   : > { %v840_v28 = vadd.f32 %v839_v25, %v775_v24  ;;  %v778_v29 = vadd.f32 %v1116_v23, %v1390_v43  ;;  %v842_v30 = vpop.f32.mrb[19].mxu0 }
 0x1dc   : > { %v877_v32 = vadd.f32 %v1442_v26, %v840_v28  ;;  %v843_v33 = vadd.f32 %v842_v30, %v778_v29  ;;  %v1117_v34 = vpop.f32.mrb[4].mxu1 }
 0x1dd   : > { %v1118_v35 = vpop.f32.mrb[5].mxu1 }
 0x1de   : > { %v885_v36 = vmul.f32 0.2, %v877_v32  ;;  %v878_v40 = vadd.f32 %v1442_v26, %v843_v33  ;;  %v1119_v38 = vadd.f32 %v1118_v35, %v1117_v34  ;;  %v1120_v39 = vpop.f32.mrb[6].mxu1 }
 0x1df   : > { %v1121_v42 = vpop.f32.mrb[7].mxu1 }
 0x1e0   : > { %v886_v44 = vmul.f32 0.2, %v878_v40  ;;  %v783_v45 = vadd.f32 %v1119_v38, %v1393_v50  ;;  %v1122_v46 = vadd.f32 %v1121_v42, %v1120_v39  ;;  %v893_v47 = vmax.f32 %v877_v32, %v885_v36 }
 0x1e2   : > { %v894_v48 = vmax.f32 %v878_v40, %v886_v44  ;;  %v848_v43 = vadd.f32 %v1165_v22, %v783_v45  ;;  %v786_v49 = vadd.f32 %v1122_v46, %v1400_v56 }
 0x1e4   : > { %v1075_v52 = vpack.c.bf16 %v894_v48, %v893_v47  ;;  %v879_v53 = vadd.f32 %v1442_v26, %v848_v43  ;;  %v851_v37 = vadd.f32 %v1166_v27, %v786_v49  ;;  %v1123_v54 = vpop.f32.mrb[8].mxu1 }
 0x1e5   : > { %v1124_v55 = vpop.f32.mrb[9].mxu1 }
 0x1e6   : > { %1076 = vst [vmem:[%s1454_s28] sm:$0xff] %v1075_v52   ;;  %v887_v50 = vmul.f32 0.2, %v879_v53  ;;  %v880_v57 = vadd.f32 %v1442_v26, %v851_v37  ;;  %v1125_v58 = vadd.f32 %v1124_v55, %v1123_v54  ;;  %v1126_v59 = vpop.f32.mrb[10].mxu1 }
 0x1e7   : > { %v1127_v56 = vpop.f32.mrb[11].mxu1  ;;  %v1169_v60 = vpop.f32.mrb[20].mxu0 }
 0x1e8   : > { %v888_v61 = vmul.f32 0.2, %v880_v57  ;;  %v1128_v62 = vadd.f32 %v1127_v56, %v1126_v59  ;;  %v791_v63 = vadd.f32 %v1125_v58, %v1407_v6  ;;  %v855_v0 = vpop.f32.mrb[21].mxu0  ;;  %v895_v2 = vmax.f32 %v879_v53, %v887_v50 }
 0x1e9   : > { %v1170_v1 = vpop.f32.mrb[22].mxu0 }
 0x1ea   : > { %v896_v3 = vmax.f32 %v880_v57, %v888_v61  ;;  %v856_v4 = vadd.f32 %v855_v0, %v791_v63  ;;  %v794_v5 = vadd.f32 %v1128_v62, %v1411_v14  ;;  %v858_v7 = vpop.f32.mrb[23].mxu0 }
 0x1ec   : > { %v1080_v8 = vpack.c.bf16 %v896_v3, %v895_v2  ;;  %v881_v9 = vadd.f32 %v1442_v26, %v856_v4  ;;  %v859_v10 = vadd.f32 %v858_v7, %v794_v5  ;;  %v1129_v11 = vpop.f32.mrb[12].mxu1 }
 0x1ed   : > { %v1130_v12 = vpop.f32.mrb[13].mxu1 }
 0x1ee   : > { %1092 = vst [vmem:[%s1454_s28 + $0x8] sm:$0xff] %v1080_v8   ;;  %v889_v13 = vmul.f32 0.2, %v881_v9  ;;  %v882_v15 = vadd.f32 %v1442_v26, %v859_v10  ;;  %v1131_v6 = vadd.f32 %v1130_v12, %v1129_v11  ;;  %v1132_v16 = vpop.f32.mrb[14].mxu1 }
 0x1ef   : > { %v1133_v17 = vpop.f32.mrb[15].mxu1 }
 0x1f0   : > { %v890_v18 = vmul.f32 0.2, %v882_v15  ;;  %v799_v51 = vadd.f32 %v1131_v6, %v1419_v31  ;;  %v1134_v14 = vadd.f32 %v1133_v17, %v1132_v16  ;;  %v897_v19 = vmax.f32 %v881_v9, %v889_v13 }
 0x1f2   : > { %v898_v20 = vmax.f32 %v882_v15, %v890_v18  ;;  %v864_v21 = vadd.f32 %v1169_v60, %v799_v51  ;;  %v802_v22 = vadd.f32 %v1134_v14, %v1423_v41 }
 0x1f4   : > { %v1085_v23 = vpack.c.bf16 %v898_v20, %v897_v19  ;;  %v883_v24 = vadd.f32 %v1442_v26, %v864_v21  ;;  %v867_v25 = vadd.f32 %v1170_v1, %v802_v22 }
 0x1f6   : > { %1093 = vst [vmem:[%s1454_s28 + $0x10] sm:$0xff] %v1085_v23   ;;  %v891_v27 = vmul.f32 0.2, %v883_v24  ;;  %v884_v28 = vadd.f32 %v1442_v26, %v867_v25 }
 0x1f8   : > { %v892_v29 = vmul.f32 0.2, %v884_v28  ;;  %v899_v30 = vmax.f32 %v883_v24, %v891_v27 }
 0x1fa   : > { %v900_v32 = vmax.f32 %v884_v28, %v892_v29 }
 0x1fc   : > { %v1090_v33 = vpack.c.bf16 %v900_v32, %v899_v30 }
 0x1fe   : > { %1094 = vst [vmem:[%s1454_s28 + $0x18] sm:$0xff] %v1090_v33  }
 0x1ff PF: > { %s15_s18 = sadd.s32 1, %s1226_s18  }
 0x200   : > { %p12_p4 = scmp.ge.s32.totalorder %s15_s18, 4  }
 0x202   :  { %14 = sbr.rel (!%p12_p4) target bundleno = 1 (0x1), region = 70 }

</bundles_post_ra>
